<compile_context>
chip_gen: v7x
topology: tpu7x:2x2x1
jax: 0.10.0
libtpu: 0.0.40
codegen_flags: <defaults>
</compile_context>

<pallas_src>
import jax
import jax.numpy as jnp
from jax.experimental import pallas as pl
from jax.experimental.pallas import tpu as pltpu


def _lstm_linear_kernel(x_ref, wih_ref, whh_ref, b_ref, wlin_ref, blin_ref,
                        out_ref):
    B, S, D = x_ref.shape
    H = whh_ref.shape[0]

    # Loop-invariant loads / broadcasts, hoisted once.
    wih = wih_ref[...]                                   # (D, 4H)
    whh = whh_ref[...]                                   # (H, 4H)
    bias = jnp.broadcast_to(b_ref[...], (B, 4 * H))      # (B, 4H), hoisted

    h = jnp.zeros((B, H), jnp.float32)
    c = jnp.zeros((B, H), jnp.float32)

    # Static unroll over the (small, compile-time-known) sequence length.
    for t in range(S):
        x_t = x_ref[:, t, :]                             # (B, D), static slice
        gates = (jnp.dot(x_t, wih, preferred_element_type=jnp.float32)
                 + jnp.dot(h, whh, preferred_element_type=jnp.float32)
                 + bias)                                 # (B, 4H)

        # Two full-vreg transcendentals instead of four quarter-width ones.
        sig = jax.nn.sigmoid(gates)
        tnh = jnp.tanh(gates)

        # PyTorch gate order: i, f, g, o
        i_g = sig[:, 0 * H:1 * H]
        f_g = sig[:, 1 * H:2 * H]
        g_g = tnh[:, 2 * H:3 * H]
        o_g = sig[:, 3 * H:4 * H]

        c = f_g * c + i_g * g_g
        h = o_g * jnp.tanh(c)

    # Fused Linear + ReLU on the final hidden state.
    y = (jnp.dot(h, wlin_ref[...], preferred_element_type=jnp.float32)
         + blin_ref[...])
    out_ref[...] = jnp.maximum(y, 0.0).astype(out_ref.dtype)


def r2n_onehot_forward(x, params):
    """x: (batch, seq, cont_dim) float32. Returns (batch, n_hidden) float32."""
    w_ih, w_hh, b_ih, b_hh, w_lin, b_lin = (params[k] for k in
                                            ("w_ih", "w_hh", "b_ih", "b_hh",
                                             "w_lin", "b_lin"))
    B, S, D = x.shape
    H = w_hh.shape[1]

    # Weight prep only (no input transpose / relayout).
    wih_t = jnp.transpose(w_ih)                          # (D, 4H)
    whh_t = jnp.transpose(w_hh)                          # (H, 4H)
    b = (b_ih + b_hh).reshape(1, 4 * H)                  # (1, 4H)
    wlin_t = jnp.transpose(w_lin)                        # (H, H)
    blin = b_lin.reshape(1, H)                           # (1, H)

    vmem = pl.BlockSpec(memory_space=pltpu.MemorySpace.VMEM)
    return pl.pallas_call(
        _lstm_linear_kernel,
        out_shape=jax.ShapeDtypeStruct((B, H), jnp.float32),
        in_specs=[vmem] * 6,
        out_specs=vmem,
    )(x, wih_t, whh_t, b, wlin_t, blin)


def _reference(x, params):
    """Pure-JAX reference matching torch.nn.LSTM + Linear + ReLU."""
    w_ih, w_hh, b_ih, b_hh, w_lin, b_lin = (params[k] for k in
                                            ("w_ih", "w_hh", "b_ih", "b_hh",
                                             "w_lin", "b_lin"))
    B, S, D = x.shape
    H = w_hh.shape[1]
    h = jnp.zeros((B, H), jnp.float32)
    c = jnp.zeros((B, H), jnp.float32)
    for t in range(S):
        x_t = x[:, t, :]
        gates = x_t @ w_ih.T + b_ih + h @ w_hh.T + b_hh
        i = jax.nn.sigmoid(gates[:, 0 * H:1 * H])
        f = jax.nn.sigmoid(gates[:, 1 * H:2 * H])
        g = jnp.tanh(gates[:, 2 * H:3 * H])
        o = jax.nn.sigmoid(gates[:, 3 * H:4 * H])
        c = f * c + i * g
        h = o * jnp.tanh(c)
    return jnp.maximum(h @ w_lin.T + b_lin, 0.0)


if __name__ == "__main__":
    # Shapes implied by the module: diminfo -> cont_dim, plus n_hidden.
    B, S, D, H = 2, 8, 16, 32

    key = jax.random.PRNGKey(0)
    keys = jax.random.split(key, 8)
    bound = 1.0 / jnp.sqrt(H)
    params = {
        "w_ih": jax.random.uniform(keys[0], (4 * H, D), jnp.float32, -bound, bound),
        "w_hh": jax.random.uniform(keys[1], (4 * H, H), jnp.float32, -bound, bound),
        "b_ih": jax.random.uniform(keys[2], (4 * H,), jnp.float32, -bound, bound),
        "b_hh": jax.random.uniform(keys[3], (4 * H,), jnp.float32, -bound, bound),
        "w_lin": jax.random.uniform(keys[4], (H, H), jnp.float32, -bound, bound),
        "b_lin": jax.random.uniform(keys[5], (H,), jnp.float32, -bound, bound),
    }
    x = jax.random.normal(keys[6], (B, S, D), jnp.float32)

    out = r2n_onehot_forward(x, params)
    out = jax.block_until_ready(out)

    ref = _reference(x, params)
    assert out.shape == (B, H)
    assert jnp.allclose(out, ref, atol=1e-5, rtol=1e-5)
    print("KERNEL_OK")
</pallas_src>

<mosaic_0001>
module attributes {stable_mosaic.version = 11 : i64} {
  func.func @_lstm_linear_kernel(%arg0: memref<2x8x16xf32, #tpu.memory_space<vmem>>, %arg1: memref<16x128xf32, #tpu.memory_space<vmem>>, %arg2: memref<32x128xf32, #tpu.memory_space<vmem>>, %arg3: memref<1x128xf32, #tpu.memory_space<vmem>>, %arg4: memref<32x32xf32, #tpu.memory_space<vmem>>, %arg5: memref<1x32xf32, #tpu.memory_space<vmem>>, %arg6: memref<2x32xf32, #tpu.memory_space<vmem>>) attributes {dimension_semantics = [], scalar_prefetch = 0 : i64, scratch_operands = 0 : i64, tpu.core_type = #tpu.core_type<tc>} {
    %c0 = arith.constant 0 : index
    %c0_0 = arith.constant 0 : index
    %0 = vector.load %arg1[%c0, %c0_0] : memref<16x128xf32, #tpu.memory_space<vmem>>, vector<16x128xf32>
    %c0_1 = arith.constant 0 : index
    %c0_2 = arith.constant 0 : index
    %1 = vector.load %arg2[%c0_1, %c0_2] : memref<32x128xf32, #tpu.memory_space<vmem>>, vector<32x128xf32>
    %c0_3 = arith.constant 0 : index
    %c0_4 = arith.constant 0 : index
    %2 = vector.load %arg3[%c0_3, %c0_4] : memref<1x128xf32, #tpu.memory_space<vmem>>, vector<1x128xf32>
    %3 = vector.shape_cast %2 : vector<1x128xf32> to vector<1x128xf32>
    %4 = vector.broadcast %3 : vector<1x128xf32> to vector<2x128xf32>
    %cst = arith.constant 0.000000e+00 : f32
    %5 = vector.broadcast %cst : f32 to vector<2x32xf32>
    %cst_5 = arith.constant 0.000000e+00 : f32
    %6 = vector.broadcast %cst_5 : f32 to vector<2x32xf32>
    %c0_6 = arith.constant 0 : index
    %c0_7 = arith.constant 0 : index
    %c0_8 = arith.constant 0 : index
    %7 = vector.load %arg0[%c0_6, %c0_7, %c0_8] : memref<2x8x16xf32, #tpu.memory_space<vmem>>, vector<2x1x16xf32>
    %8 = vector.shape_cast %7 : vector<2x1x16xf32> to vector<2x16xf32>
    %cst_9 = arith.constant dense<0.000000e+00> : vector<2x128xf32>
    %9 = tpu.matmul %8, %0, %cst_9 {dimension_numbers = #tpu.dot_dimension_numbers<[1], [0], [0], [1], [0, 0, 1, 1], [], []>} : vector<2x16xf32>, vector<16x128xf32>, vector<2x128xf32> -> vector<2x128xf32>
    %cst_10 = arith.constant dense<0.000000e+00> : vector<2x128xf32>
    %10 = tpu.matmul %5, %1, %cst_10 {dimension_numbers = #tpu.dot_dimension_numbers<[1], [0], [0], [1], [0, 0, 1, 1], [], []>} : vector<2x32xf32>, vector<32x128xf32>, vector<2x128xf32> -> vector<2x128xf32>
    %11 = arith.addf %9, %10 : vector<2x128xf32>
    %12 = arith.addf %11, %4 : vector<2x128xf32>
    %13 = arith.negf %12 : vector<2x128xf32>
    %14 = math.exp %13 : vector<2x128xf32>
    %cst_11 = arith.constant 1.000000e+00 : f32
    %15 = vector.broadcast %cst_11 : f32 to vector<2x128xf32>
    %16 = arith.addf %15, %14 : vector<2x128xf32>
    %17 = arith.divf %15, %16 : vector<2x128xf32>
    %18 = math.tanh %12 : vector<2x128xf32>
    %19 = vector.extract_strided_slice %17 {offsets = [0, 0], sizes = [2, 32], strides = [1, 1]} : vector<2x128xf32> to vector<2x32xf32>
    %20 = vector.extract_strided_slice %17 {offsets = [0, 32], sizes = [2, 32], strides = [1, 1]} : vector<2x128xf32> to vector<2x32xf32>
    %21 = vector.extract_strided_slice %18 {offsets = [0, 64], sizes = [2, 32], strides = [1, 1]} : vector<2x128xf32> to vector<2x32xf32>
    %22 = vector.extract_strided_slice %17 {offsets = [0, 96], sizes = [2, 32], strides = [1, 1]} : vector<2x128xf32> to vector<2x32xf32>
    %23 = arith.mulf %20, %6 : vector<2x32xf32>
    %24 = arith.mulf %19, %21 : vector<2x32xf32>
    %25 = arith.addf %23, %24 : vector<2x32xf32>
    %26 = math.tanh %25 : vector<2x32xf32>
    %27 = arith.mulf %22, %26 : vector<2x32xf32>
    %c0_12 = arith.constant 0 : index
    %c1 = arith.constant 1 : index
    %c0_13 = arith.constant 0 : index
    %28 = vector.load %arg0[%c0_12, %c1, %c0_13] : memref<2x8x16xf32, #tpu.memory_space<vmem>>, vector<2x1x16xf32>
    %29 = vector.shape_cast %28 : vector<2x1x16xf32> to vector<2x16xf32>
    %cst_14 = arith.constant dense<0.000000e+00> : vector<2x128xf32>
    %30 = tpu.matmul %29, %0, %cst_14 {dimension_numbers = #tpu.dot_dimension_numbers<[1], [0], [0], [1], [0, 0, 1, 1], [], []>} : vector<2x16xf32>, vector<16x128xf32>, vector<2x128xf32> -> vector<2x128xf32>
    %cst_15 = arith.constant dense<0.000000e+00> : vector<2x128xf32>
    %31 = tpu.matmul %27, %1, %cst_15 {dimension_numbers = #tpu.dot_dimension_numbers<[1], [0], [0], [1], [0, 0, 1, 1], [], []>} : vector<2x32xf32>, vector<32x128xf32>, vector<2x128xf32> -> vector<2x128xf32>
    %32 = arith.addf %30, %31 : vector<2x128xf32>
    %33 = arith.addf %32, %4 : vector<2x128xf32>
    %34 = arith.negf %33 : vector<2x128xf32>
    %35 = math.exp %34 : vector<2x128xf32>
    %cst_16 = arith.constant 1.000000e+00 : f32
    %36 = vector.broadcast %cst_16 : f32 to vector<2x128xf32>
    %37 = arith.addf %36, %35 : vector<2x128xf32>
    %38 = arith.divf %36, %37 : vector<2x128xf32>
    %39 = math.tanh %33 : vector<2x128xf32>
    %40 = vector.extract_strided_slice %38 {offsets = [0, 0], sizes = [2, 32], strides = [1, 1]} : vector<2x128xf32> to vector<2x32xf32>
    %41 = vector.extract_strided_slice %38 {offsets = [0, 32], sizes = [2, 32], strides = [1, 1]} : vector<2x128xf32> to vector<2x32xf32>
    %42 = vector.extract_strided_slice %39 {offsets = [0, 64], sizes = [2, 32], strides = [1, 1]} : vector<2x128xf32> to vector<2x32xf32>
    %43 = vector.extract_strided_slice %38 {offsets = [0, 96], sizes = [2, 32], strides = [1, 1]} : vector<2x128xf32> to vector<2x32xf32>
    %44 = arith.mulf %41, %25 : vector<2x32xf32>
    %45 = arith.mulf %40, %42 : vector<2x32xf32>
    %46 = arith.addf %44, %45 : vector<2x32xf32>
    %47 = math.tanh %46 : vector<2x32xf32>
    %48 = arith.mulf %43, %47 : vector<2x32xf32>
    %c0_17 = arith.constant 0 : index
    %c2 = arith.constant 2 : index
    %c0_18 = arith.constant 0 : index
    %49 = vector.load %arg0[%c0_17, %c2, %c0_18] : memref<2x8x16xf32, #tpu.memory_space<vmem>>, vector<2x1x16xf32>
    %50 = vector.shape_cast %49 : vector<2x1x16xf32> to vector<2x16xf32>
    %cst_19 = arith.constant dense<0.000000e+00> : vector<2x128xf32>
    %51 = tpu.matmul %50, %0, %cst_19 {dimension_numbers = #tpu.dot_dimension_numbers<[1], [0], [0], [1], [0, 0, 1, 1], [], []>} : vector<2x16xf32>, vector<16x128xf32>, vector<2x128xf32> -> vector<2x128xf32>
    %cst_20 = arith.constant dense<0.000000e+00> : vector<2x128xf32>
    %52 = tpu.matmul %48, %1, %cst_20 {dimension_numbers = #tpu.dot_dimension_numbers<[1], [0], [0], [1], [0, 0, 1, 1], [], []>} : vector<2x32xf32>, vector<32x128xf32>, vector<2x128xf32> -> vector<2x128xf32>
    %53 = arith.addf %51, %52 : vector<2x128xf32>
    %54 = arith.addf %53, %4 : vector<2x128xf32>
    %55 = arith.negf %54 : vector<2x128xf32>
    %56 = math.exp %55 : vector<2x128xf32>
    %cst_21 = arith.constant 1.000000e+00 : f32
    %57 = vector.broadcast %cst_21 : f32 to vector<2x128xf32>
    %58 = arith.addf %57, %56 : vector<2x128xf32>
    %59 = arith.divf %57, %58 : vector<2x128xf32>
    %60 = math.tanh %54 : vector<2x128xf32>
    %61 = vector.extract_strided_slice %59 {offsets = [0, 0], sizes = [2, 32], strides = [1, 1]} : vector<2x128xf32> to vector<2x32xf32>
    %62 = vector.extract_strided_slice %59 {offsets = [0, 32], sizes = [2, 32], strides = [1, 1]} : vector<2x128xf32> to vector<2x32xf32>
    %63 = vector.extract_strided_slice %60 {offsets = [0, 64], sizes = [2, 32], strides = [1, 1]} : vector<2x128xf32> to vector<2x32xf32>
    %64 = vector.extract_strided_slice %59 {offsets = [0, 96], sizes = [2, 32], strides = [1, 1]} : vector<2x128xf32> to vector<2x32xf32>
    %65 = arith.mulf %62, %46 : vector<2x32xf32>
    %66 = arith.mulf %61, %63 : vector<2x32xf32>
    %67 = arith.addf %65, %66 : vector<2x32xf32>
    %68 = math.tanh %67 : vector<2x32xf32>
    %69 = arith.mulf %64, %68 : vector<2x32xf32>
    %c0_22 = arith.constant 0 : index
    %c3 = arith.constant 3 : index
    %c0_23 = arith.constant 0 : index
    %70 = vector.load %arg0[%c0_22, %c3, %c0_23] : memref<2x8x16xf32, #tpu.memory_space<vmem>>, vector<2x1x16xf32>
    %71 = vector.shape_cast %70 : vector<2x1x16xf32> to vector<2x16xf32>
    %cst_24 = arith.constant dense<0.000000e+00> : vector<2x128xf32>
    %72 = tpu.matmul %71, %0, %cst_24 {dimension_numbers = #tpu.dot_dimension_numbers<[1], [0], [0], [1], [0, 0, 1, 1], [], []>} : vector<2x16xf32>, vector<16x128xf32>, vector<2x128xf32> -> vector<2x128xf32>
    %cst_25 = arith.constant dense<0.000000e+00> : vector<2x128xf32>
    %73 = tpu.matmul %69, %1, %cst_25 {dimension_numbers = #tpu.dot_dimension_numbers<[1], [0], [0], [1], [0, 0, 1, 1], [], []>} : vector<2x32xf32>, vector<32x128xf32>, vector<2x128xf32> -> vector<2x128xf32>
    %74 = arith.addf %72, %73 : vector<2x128xf32>
    %75 = arith.addf %74, %4 : vector<2x128xf32>
    %76 = arith.negf %75 : vector<2x128xf32>
    %77 = math.exp %76 : vector<2x128xf32>
    %cst_26 = arith.constant 1.000000e+00 : f32
    %78 = vector.broadcast %cst_26 : f32 to vector<2x128xf32>
    %79 = arith.addf %78, %77 : vector<2x128xf32>
    %80 = arith.divf %78, %79 : vector<2x128xf32>
    %81 = math.tanh %75 : vector<2x128xf32>
    %82 = vector.extract_strided_slice %80 {offsets = [0, 0], sizes = [2, 32], strides = [1, 1]} : vector<2x128xf32> to vector<2x32xf32>
    %83 = vector.extract_strided_slice %80 {offsets = [0, 32], sizes = [2, 32], strides = [1, 1]} : vector<2x128xf32> to vector<2x32xf32>
    %84 = vector.extract_strided_slice %81 {offsets = [0, 64], sizes = [2, 32], strides = [1, 1]} : vector<2x128xf32> to vector<2x32xf32>
    %85 = vector.extract_strided_slice %80 {offsets = [0, 96], sizes = [2, 32], strides = [1, 1]} : vector<2x128xf32> to vector<2x32xf32>
    %86 = arith.mulf %83, %67 : vector<2x32xf32>
    %87 = arith.mulf %82, %84 : vector<2x32xf32>
    %88 = arith.addf %86, %87 : vector<2x32xf32>
    %89 = math.tanh %88 : vector<2x32xf32>
    %90 = arith.mulf %85, %89 : vector<2x32xf32>
    %c0_27 = arith.constant 0 : index
    %c4 = arith.constant 4 : index
    %c0_28 = arith.constant 0 : index
    %91 = vector.load %arg0[%c0_27, %c4, %c0_28] : memref<2x8x16xf32, #tpu.memory_space<vmem>>, vector<2x1x16xf32>
    %92 = vector.shape_cast %91 : vector<2x1x16xf32> to vector<2x16xf32>
    %cst_29 = arith.constant dense<0.000000e+00> : vector<2x128xf32>
    %93 = tpu.matmul %92, %0, %cst_29 {dimension_numbers = #tpu.dot_dimension_numbers<[1], [0], [0], [1], [0, 0, 1, 1], [], []>} : vector<2x16xf32>, vector<16x128xf32>, vector<2x128xf32> -> vector<2x128xf32>
    %cst_30 = arith.constant dense<0.000000e+00> : vector<2x128xf32>
    %94 = tpu.matmul %90, %1, %cst_30 {dimension_numbers = #tpu.dot_dimension_numbers<[1], [0], [0], [1], [0, 0, 1, 1], [], []>} : vector<2x32xf32>, vector<32x128xf32>, vector<2x128xf32> -> vector<2x128xf32>
    %95 = arith.addf %93, %94 : vector<2x128xf32>
    %96 = arith.addf %95, %4 : vector<2x128xf32>
    %97 = arith.negf %96 : vector<2x128xf32>
    %98 = math.exp %97 : vector<2x128xf32>
    %cst_31 = arith.constant 1.000000e+00 : f32
    %99 = vector.broadcast %cst_31 : f32 to vector<2x128xf32>
    %100 = arith.addf %99, %98 : vector<2x128xf32>
    %101 = arith.divf %99, %100 : vector<2x128xf32>
    %102 = math.tanh %96 : vector<2x128xf32>
    %103 = vector.extract_strided_slice %101 {offsets = [0, 0], sizes = [2, 32], strides = [1, 1]} : vector<2x128xf32> to vector<2x32xf32>
    %104 = vector.extract_strided_slice %101 {offsets = [0, 32], sizes = [2, 32], strides = [1, 1]} : vector<2x128xf32> to vector<2x32xf32>
    %105 = vector.extract_strided_slice %102 {offsets = [0, 64], sizes = [2, 32], strides = [1, 1]} : vector<2x128xf32> to vector<2x32xf32>
    %106 = vector.extract_strided_slice %101 {offsets = [0, 96], sizes = [2, 32], strides = [1, 1]} : vector<2x128xf32> to vector<2x32xf32>
    %107 = arith.mulf %104, %88 : vector<2x32xf32>
    %108 = arith.mulf %103, %105 : vector<2x32xf32>
    %109 = arith.addf %107, %108 : vector<2x32xf32>
    %110 = math.tanh %109 : vector<2x32xf32>
    %111 = arith.mulf %106, %110 : vector<2x32xf32>
    %c0_32 = arith.constant 0 : index
    %c5 = arith.constant 5 : index
    %c0_33 = arith.constant 0 : index
    %112 = vector.load %arg0[%c0_32, %c5, %c0_33] : memref<2x8x16xf32, #tpu.memory_space<vmem>>, vector<2x1x16xf32>
    %113 = vector.shape_cast %112 : vector<2x1x16xf32> to vector<2x16xf32>
    %cst_34 = arith.constant dense<0.000000e+00> : vector<2x128xf32>
    %114 = tpu.matmul %113, %0, %cst_34 {dimension_numbers = #tpu.dot_dimension_numbers<[1], [0], [0], [1], [0, 0, 1, 1], [], []>} : vector<2x16xf32>, vector<16x128xf32>, vector<2x128xf32> -> vector<2x128xf32>
    %cst_35 = arith.constant dense<0.000000e+00> : vector<2x128xf32>
    %115 = tpu.matmul %111, %1, %cst_35 {dimension_numbers = #tpu.dot_dimension_numbers<[1], [0], [0], [1], [0, 0, 1, 1], [], []>} : vector<2x32xf32>, vector<32x128xf32>, vector<2x128xf32> -> vector<2x128xf32>
    %116 = arith.addf %114, %115 : vector<2x128xf32>
    %117 = arith.addf %116, %4 : vector<2x128xf32>
    %118 = arith.negf %117 : vector<2x128xf32>
    %119 = math.exp %118 : vector<2x128xf32>
    %cst_36 = arith.constant 1.000000e+00 : f32
    %120 = vector.broadcast %cst_36 : f32 to vector<2x128xf32>
    %121 = arith.addf %120, %119 : vector<2x128xf32>
    %122 = arith.divf %120, %121 : vector<2x128xf32>
    %123 = math.tanh %117 : vector<2x128xf32>
    %124 = vector.extract_strided_slice %122 {offsets = [0, 0], sizes = [2, 32], strides = [1, 1]} : vector<2x128xf32> to vector<2x32xf32>
    %125 = vector.extract_strided_slice %122 {offsets = [0, 32], sizes = [2, 32], strides = [1, 1]} : vector<2x128xf32> to vector<2x32xf32>
    %126 = vector.extract_strided_slice %123 {offsets = [0, 64], sizes = [2, 32], strides = [1, 1]} : vector<2x128xf32> to vector<2x32xf32>
    %127 = vector.extract_strided_slice %122 {offsets = [0, 96], sizes = [2, 32], strides = [1, 1]} : vector<2x128xf32> to vector<2x32xf32>
    %128 = arith.mulf %125, %109 : vector<2x32xf32>
    %129 = arith.mulf %124, %126 : vector<2x32xf32>
    %130 = arith.addf %128, %129 : vector<2x32xf32>
    %131 = math.tanh %130 : vector<2x32xf32>
    %132 = arith.mulf %127, %131 : vector<2x32xf32>
    %c0_37 = arith.constant 0 : index
    %c6 = arith.constant 6 : index
    %c0_38 = arith.constant 0 : index
    %133 = vector.load %arg0[%c0_37, %c6, %c0_38] : memref<2x8x16xf32, #tpu.memory_space<vmem>>, vector<2x1x16xf32>
    %134 = vector.shape_cast %133 : vector<2x1x16xf32> to vector<2x16xf32>
    %cst_39 = arith.constant dense<0.000000e+00> : vector<2x128xf32>
    %135 = tpu.matmul %134, %0, %cst_39 {dimension_numbers = #tpu.dot_dimension_numbers<[1], [0], [0], [1], [0, 0, 1, 1], [], []>} : vector<2x16xf32>, vector<16x128xf32>, vector<2x128xf32> -> vector<2x128xf32>
    %cst_40 = arith.constant dense<0.000000e+00> : vector<2x128xf32>
    %136 = tpu.matmul %132, %1, %cst_40 {dimension_numbers = #tpu.dot_dimension_numbers<[1], [0], [0], [1], [0, 0, 1, 1], [], []>} : vector<2x32xf32>, vector<32x128xf32>, vector<2x128xf32> -> vector<2x128xf32>
    %137 = arith.addf %135, %136 : vector<2x128xf32>
    %138 = arith.addf %137, %4 : vector<2x128xf32>
    %139 = arith.negf %138 : vector<2x128xf32>
    %140 = math.exp %139 : vector<2x128xf32>
    %cst_41 = arith.constant 1.000000e+00 : f32
    %141 = vector.broadcast %cst_41 : f32 to vector<2x128xf32>
    %142 = arith.addf %141, %140 : vector<2x128xf32>
    %143 = arith.divf %141, %142 : vector<2x128xf32>
    %144 = math.tanh %138 : vector<2x128xf32>
    %145 = vector.extract_strided_slice %143 {offsets = [0, 0], sizes = [2, 32], strides = [1, 1]} : vector<2x128xf32> to vector<2x32xf32>
    %146 = vector.extract_strided_slice %143 {offsets = [0, 32], sizes = [2, 32], strides = [1, 1]} : vector<2x128xf32> to vector<2x32xf32>
    %147 = vector.extract_strided_slice %144 {offsets = [0, 64], sizes = [2, 32], strides = [1, 1]} : vector<2x128xf32> to vector<2x32xf32>
    %148 = vector.extract_strided_slice %143 {offsets = [0, 96], sizes = [2, 32], strides = [1, 1]} : vector<2x128xf32> to vector<2x32xf32>
    %149 = arith.mulf %146, %130 : vector<2x32xf32>
    %150 = arith.mulf %145, %147 : vector<2x32xf32>
    %151 = arith.addf %149, %150 : vector<2x32xf32>
    %152 = math.tanh %151 : vector<2x32xf32>
    %153 = arith.mulf %148, %152 : vector<2x32xf32>
    %c0_42 = arith.constant 0 : index
    %c7 = arith.constant 7 : index
    %c0_43 = arith.constant 0 : index
    %154 = vector.load %arg0[%c0_42, %c7, %c0_43] : memref<2x8x16xf32, #tpu.memory_space<vmem>>, vector<2x1x16xf32>
    %155 = vector.shape_cast %154 : vector<2x1x16xf32> to vector<2x16xf32>
    %cst_44 = arith.constant dense<0.000000e+00> : vector<2x128xf32>
    %156 = tpu.matmul %155, %0, %cst_44 {dimension_numbers = #tpu.dot_dimension_numbers<[1], [0], [0], [1], [0, 0, 1, 1], [], []>} : vector<2x16xf32>, vector<16x128xf32>, vector<2x128xf32> -> vector<2x128xf32>
    %cst_45 = arith.constant dense<0.000000e+00> : vector<2x128xf32>
    %157 = tpu.matmul %153, %1, %cst_45 {dimension_numbers = #tpu.dot_dimension_numbers<[1], [0], [0], [1], [0, 0, 1, 1], [], []>} : vector<2x32xf32>, vector<32x128xf32>, vector<2x128xf32> -> vector<2x128xf32>
    %158 = arith.addf %156, %157 : vector<2x128xf32>
    %159 = arith.addf %158, %4 : vector<2x128xf32>
    %160 = arith.negf %159 : vector<2x128xf32>
    %161 = math.exp %160 : vector<2x128xf32>
    %cst_46 = arith.constant 1.000000e+00 : f32
    %162 = vector.broadcast %cst_46 : f32 to vector<2x128xf32>
    %163 = arith.addf %162, %161 : vector<2x128xf32>
    %164 = arith.divf %162, %163 : vector<2x128xf32>
    %165 = math.tanh %159 : vector<2x128xf32>
    %166 = vector.extract_strided_slice %164 {offsets = [0, 0], sizes = [2, 32], strides = [1, 1]} : vector<2x128xf32> to vector<2x32xf32>
    %167 = vector.extract_strided_slice %164 {offsets = [0, 32], sizes = [2, 32], strides = [1, 1]} : vector<2x128xf32> to vector<2x32xf32>
    %168 = vector.extract_strided_slice %165 {offsets = [0, 64], sizes = [2, 32], strides = [1, 1]} : vector<2x128xf32> to vector<2x32xf32>
    %169 = vector.extract_strided_slice %164 {offsets = [0, 96], sizes = [2, 32], strides = [1, 1]} : vector<2x128xf32> to vector<2x32xf32>
    %170 = arith.mulf %167, %151 : vector<2x32xf32>
    %171 = arith.mulf %166, %168 : vector<2x32xf32>
    %172 = arith.addf %170, %171 : vector<2x32xf32>
    %173 = math.tanh %172 : vector<2x32xf32>
    %174 = arith.mulf %169, %173 : vector<2x32xf32>
    %c0_47 = arith.constant 0 : index
    %c0_48 = arith.constant 0 : index
    %175 = vector.load %arg4[%c0_47, %c0_48] : memref<32x32xf32, #tpu.memory_space<vmem>>, vector<32x32xf32>
    %cst_49 = arith.constant dense<0.000000e+00> : vector<2x32xf32>
    %176 = tpu.matmul %174, %175, %cst_49 {dimension_numbers = #tpu.dot_dimension_numbers<[1], [0], [0], [1], [0, 0, 1, 1], [], []>} : vector<2x32xf32>, vector<32x32xf32>, vector<2x32xf32> -> vector<2x32xf32>
    %c0_50 = arith.constant 0 : index
    %c0_51 = arith.constant 0 : index
    %177 = vector.load %arg5[%c0_50, %c0_51] : memref<1x32xf32, #tpu.memory_space<vmem>>, vector<1x32xf32>
    %178 = vector.broadcast %177 : vector<1x32xf32> to vector<2x32xf32>
    %179 = arith.addf %176, %178 : vector<2x32xf32>
    %cst_52 = arith.constant 0.000000e+00 : f32
    %180 = vector.broadcast %cst_52 : f32 to vector<2x32xf32>
    %181 = arith.maximumf %179, %180 : vector<2x32xf32>
    %c0_53 = arith.constant 0 : index
    %c0_54 = arith.constant 0 : index
    %182 = vector.load %arg6[%c0_53, %c0_54] : memref<2x32xf32, #tpu.memory_space<vmem>>, vector<2x32xf32>
    tpu.vector_store %arg6[%c0_53, %c0_54], %181 {strides = array<i32>} : memref<2x32xf32, #tpu.memory_space<vmem>>, vector<2x32xf32>,
    return
  }
}

</mosaic_0001>

<bundles_post_ra>
// kernel: tpu_custom_call.1
= control target key start
LH: loop header
LB: loop body
LE: loop exit
PB: predicated region body
PF: predicated region fallthrough
CT: control target
= control target key end

     0   :  { %11 = vsyncpa [#allocation3], 0  ;;  %s2441_s0 = inlined_call_operand.hbm [shape: f32[2,8,16], index: 0, kind: input, shape index: {}]   ;;  %s2442_s1 = inlined_call_operand.hbm [shape: f32[16,128], index: 1, kind: input, shape index: {}]   ;;  %s2443_s2 = inlined_call_operand.hbm [shape: f32[32,128], index: 2, kind: input, shape index: {}]   ;;  %s2444_s3 = inlined_call_operand.vmem [shape: f32[1,128], index: 3, kind: input, shape index: {}]   ;;  %s2445_s4 = inlined_call_operand.hbm [shape: f32[32,32], index: 4, kind: input, shape index: {}]   ;;  %s2446_s5 = inlined_call_operand.vmem [shape: f32[1,32], index: 5, kind: input, shape index: {}]   ;;  %s2447_s6 = inlined_call_operand.hbm [shape: f32[2,32], index: 6, kind: output, shape index: {}]  }
   0x1   :  { %12 = vsyncpa [#allocation6], 0 }
   0x2   :  { %13 = vsyncpa [#allocation9], 0 }
   0x3   :  { %14 = vsyncpa [#allocation4], 0  ;;  %s2145_s21 = smov [#allocation5]   ;;  %s2146_s23 = smov [#allocation2]  }
   0x4   :  { %s32_s22 = sshll.u32 %s2145_s21, 4  ;;  %s20_s24 = sshll.u32 %s2146_s23, 4  ;;  %s33_s22 = int_to_ptr.vmem [resolvable:$true] %s32_s22  ;;  %s2192_s24 = int_to_ptr.vmem [resolvable:$true] %s20_s24 }
   0x5   :  { %s2027_s27 = scalar_lea.hbm %s2442_s1, 256 }
   0x6   :  { %p2028_p0 = scmp.ne.s32.totalorder %s2442_s1, %s2027_s27  ;;  %p2031_p1 = scmp.lt.u32.totalorder %s2027_s27, %s2442_s1 }
   0x8   :  { %p2033_p2 = pnand %p2031_p1, %p2028_p0 }
   0xa   :  { %2036 = shalt.err (!%p2033_p2)
}
   0xb   :  { %s2037_s8 = scalar_lea.vmem %s33_s22, 256  ;;  %p2042_p4 = scmp.lt.s32.totalorder %s33_s22, %s33_s22 }
   0xc   :  { %p2038_p3 = scmp.ne.s32.totalorder %s33_s22, %s2037_s8  ;;  %p2043_p5 = scmp.lt.s32.totalorder %s2037_s8, %s2037_s8 }
   0xe   :  { %p2044_p6 = por %p2043_p5, %p2042_p4 }
  0x10   :  { %p2045_p7 = pnand %p2044_p6, %p2038_p3 }
  0x12   :  { %2048 = shalt.err (!%p2045_p7)
}
  0x13   :  { %s2147_s9 = smov 128   ;;  %s2148_s10 = smov 8  }
  0x14   :  { %38 = dma.hbm_to_vmem [thread:$0]  %s2442_s1, 256, %s33_s22, [#allocation6], %s2147_s9, %s2147_s9, %s2148_s10  }
  0x15   :  { %s2049_s15 = scalar_lea.hbm %s2441_s0, 256 }
  0x16   :  { %p2050_p8 = scmp.ne.s32.totalorder %s2441_s0, %s2049_s15  ;;  %p2053_p9 = scmp.lt.u32.totalorder %s2049_s15, %s2441_s0 }
  0x18   :  { %p2055_p10 = pnand %p2053_p9, %p2050_p8 }
  0x1a   :  { %2058 = shalt.err (!%p2055_p10)
}
  0x1b   :  { %s2059_s20 = scalar_lea.vmem %s2192_s24, 256  ;;  %p2064_p12 = scmp.lt.s32.totalorder %s2192_s24, %s2192_s24 }
  0x1c   :  { %p2060_p11 = scmp.ne.s32.totalorder %s2192_s24, %s2059_s20  ;;  %p2065_p13 = scmp.lt.s32.totalorder %s2059_s20, %s2059_s20 }
  0x1e   :  { %p2066_p0 = por %p2065_p13, %p2064_p12 }
  0x20   :  { %p2067_p1 = pnand %p2066_p0, %p2060_p11 }
  0x22   :  { %2070 = shalt.err (!%p2067_p1)
}
  0x23   :  { %26 = dma.hbm_to_vmem [thread:$0]  %s2441_s0, 256, %s2192_s24, [#allocation3], %s2147_s9, %s2147_s9, %s2148_s10  }
  0x24   :  { %s2149_s22 = smov [#allocation7]   ;;  %s2150_s25 = smov [#allocation8]  }
  0x25   :  { %s44_s23 = sshll.u32 %s2149_s22, 4  ;;  %s58_s26 = sshll.u32 %s2150_s25, 4  ;;  %s45_s23 = int_to_ptr.vmem [resolvable:$true] %s44_s23  ;;  %s2229_s26 = int_to_ptr.vmem [resolvable:$true] %s58_s26 }
  0x26   :  { %s2071_s29 = scalar_lea.hbm %s2443_s2, 512 }
  0x27   :  { %p2072_p2 = scmp.ne.s32.totalorder %s2443_s2, %s2071_s29  ;;  %p2075_p3 = scmp.lt.u32.totalorder %s2071_s29, %s2443_s2 }
  0x29   :  { %p2077_p4 = pnand %p2075_p3, %p2072_p2 }
  0x2b   :  { %2080 = shalt.err (!%p2077_p4)
}
  0x2c   :  { %s2081_s0 = scalar_lea.vmem %s45_s23, 512  ;;  %p2086_p6 = scmp.lt.s32.totalorder %s45_s23, %s45_s23 }
  0x2d   :  { %p2082_p5 = scmp.ne.s32.totalorder %s45_s23, %s2081_s0  ;;  %p2087_p7 = scmp.lt.s32.totalorder %s2081_s0, %s2081_s0 }
  0x2f   :  { %p2088_p8 = por %p2087_p7, %p2086_p6 }
  0x31   :  { %p2089_p9 = pnand %p2088_p8, %p2082_p5 }
  0x33   :  { %2092 = shalt.err (!%p2089_p9)
}
  0x34   :  { %50 = dma.hbm_to_vmem [thread:$0]  %s2443_s2, 512, %s45_s23, [#allocation6], %s2147_s9, %s2147_s9, %s2148_s10  }
  0x35   :  { %s2093_s15 = scalar_lea.hbm %s2445_s4, 512 }
  0x36   :  { %p2094_p10 = scmp.ne.s32.totalorder %s2445_s4, %s2093_s15  ;;  %p2097_p11 = scmp.lt.u32.totalorder %s2093_s15, %s2445_s4 }
  0x38   :  { %p2099_p12 = pnand %p2097_p11, %p2094_p10 }
  0x3a   :  { %2102 = shalt.err (!%p2099_p12)
}
  0x3b   :  { %s2103_s20 = scalar_lea.vmem %s2229_s26, 512  ;;  %p2108_p0 = scmp.lt.s32.totalorder %s2229_s26, %s2229_s26 }
  0x3c   :  { %p2104_p13 = scmp.ne.s32.totalorder %s2229_s26, %s2103_s20  ;;  %p2109_p1 = scmp.lt.s32.totalorder %s2103_s20, %s2103_s20 }
  0x3e   :  { %p2110_p2 = por %p2109_p1, %p2108_p0 }
  0x40   :  { %p2111_p3 = pnand %p2110_p2, %p2104_p13 }
  0x42   :  { %2114 = shalt.err (!%p2111_p3)
}
  0x43   :  { %64 = dma.hbm_to_vmem [thread:$0]  %s2445_s4, 512, %s2229_s26, [#allocation9], %s2147_s9, %s2147_s9, %s2148_s10  }
  0x44   :  { %2137 = dma.done.wait [#allocation3], 256  }
  0x45   :  { %2138 = vsyncadd [#allocation3], 4294967040 }
  0x46   :  { %2139 = dma.done.wait [#allocation6], 768  }
  0x47   :  { %2140 = vsyncadd [#allocation6], 4294966528 }
  0x48   :  { %2141 = dma.done.wait [#allocation9], 512  }
  0x49   :  { %2142 = vsyncadd [#allocation9], 4294966784  ;;  %v2151_v0 = vmov 0.0|0.0   ;;  %vm2152_vm0 = vmmov 0   ;;  %v2153_v1 = vmov 0.0   ;;  %v81_v2 = vld [vmem:[#allocation7] sm:$0xff] }
  0x4a   :  { %1873 = vmatprep.subr.bf16.mxu0 %v2151_v0  ;;  %1879 = vmatprep.subr.bf16.mxu1 %v2151_v0  ;;  %v82_v3 = vld [vmem:[#allocation7 + $0x8] sm:$0xff]  ;;  %v79_v4 = vld [vmem:[#allocation5] sm:$0xff]  ;;  %v80_v6 = vld [vmem:[#allocation5 + $0x8] sm:$0xff]  ;;  %vm171_vm1 = vcmask 1041409   ;;  %vm173_vm2 = vcmask 130048   ;;  %s2154_s10 = smov 64  }
  0x4b   :  { %1733 = vmatprep.mubr.msk.f32.mxu1 %vm2152_vm0, %v2153_v1  ;;  %1726 = vmatprep.mubr.msk.f32.mxu0 %vm2152_vm0, %v2153_v1  ;;  %v2272_v5 = vpack.c.bf16 %v82_v3, %v81_v2  ;;  %v83_v7 = vld [vmem:[#allocation7 + $0x10] sm:$0xff]  ;;  %v84_v8 = vld [vmem:[#allocation7 + $0x18] sm:$0xff]  ;;  %v2274_v9 = vpack.c.bf16 %v80_v6, %v79_v4  ;;  %v92_v10 = vld [vmem:[#allocation2] sm:$0x1]  ;;  %vm94_vm3 = vcmask 261120   ;;  %s2156_s23 = smov [#allocation10]  }
  0x4c   :  { %v93_v11 = vld [vmem:[#allocation2 + $0x8] sm:$0x1]  ;;  %v2277_v12 = vpack.c.bf16 %v84_v8, %v83_v7  ;;  %v2302_v17 = vld [vmem:[%s2444_s3] ss:$0 sm:$0xff]  ;;  %s2155_s3 = smov 32   ;;  %s1612_s25 = sshll.u32 %s2156_s23, 4  ;;  %s1613_s25 = int_to_ptr.vmem [resolvable:$true] %s1612_s25 }
  0x4d   :  { %1875 = vmatpush3.bf16.msra.mxu0 %v2272_v5  ;;  %v170_v13 = vrot.slane %v93_v11, 7  ;;  %1881 = vmatpush3.bf16.msra.mxu1 %v2274_v9  ;;  %v272_v35 = vld [vmem:[#allocation2 + $0x9] sm:$0x1]  ;;  %v271_v37 = vld [vmem:[#allocation2 + $0x1] sm:$0x1]  ;;  %vm1604_vm4 = vcmask 254976   ;;  %p2120_p5 = scmp.lt.s32.totalorder %s1613_s25, %s1613_s25 }
  0x4e   :  { %1876 = vmatprep.subr.bf16.mxu0 %v2151_v0  ;;  %1882 = vmatprep.subr.bf16.mxu1 %v2151_v0  ;;  %v350_v36 = vrot.slane %v272_v35, 7  ;;  %v449_v56 = vld [vmem:[#allocation2 + $0x2] sm:$0x1]  ;;  %v450_v57 = vld [vmem:[#allocation2 + $0xa] sm:$0x1]  ;;  %s2115_s26 = scalar_lea.vmem %s1613_s25, 32 }
  0x4f   :  { %v172_v14 = vsel %vm171_vm1, %v170_v13, %v92_v10  ;;  %v528_v58 = vrot.slane %v450_v57, 7  ;;  %p2116_p4 = scmp.ne.s32.totalorder %s1613_s25, %s2115_s26  ;;  %p2121_p6 = scmp.lt.s32.totalorder %s2115_s26, %s2115_s26 }
  0x50   :  { %1734 = vmatmul.mubr.msk.f32.vlgmr.msra.gmra.mrb[0].mxu1 %vm173_vm2, %v172_v14  ;;  %v351_v39 = vsel %vm171_vm1, %v350_v36, %v271_v37 }
  0x51   :  { %1878 = vmatpush3.bf16.msra.mxu0 %v2277_v12  ;;  %1884 = vmatpush3.bf16.msra.mxu1 %v2272_v5  ;;  %v529_v59 = vsel %vm171_vm1, %v528_v58, %v449_v56  ;;  %p2122_p7 = por %p2121_p6, %p2120_p5 }
  0x52   :  { %1744 = vmatprep.mubr.msk.f32.mxu1 %vm2152_vm0, %v2153_v1  ;;  %1885 = vmatprep.subr.bf16.mxu1 %v2151_v0 }
  0x53   :  { %1891 = vmatprep.subr.bf16.mxu0 %v2151_v0  ;;  %p2123_p8 = pnand %p2122_p7, %p2116_p4 }
  0x54   :  { %1727 = vmatmul.mubr.f32.vlgmr.msra.gmra.mrb[0].mxu0 %v2153_v1 }
  0x55   :  { %1893 = vmatpush3.bf16.msra.mxu0 %v2272_v5  ;;  %1762 = vmatprep.mubr.msk.f32.mxu0 %vm2152_vm0, %v2153_v1 }
  0x56   :  { %1887 = vmatpush3.bf16.msra.mxu1 %v2277_v12  ;;  %1894 = vmatprep.subr.bf16.mxu0 %v2151_v0 }
  0x57   :  { %1888 = vmatprep.subr.bf16.mxu1 %v2151_v0 }
  0x59   :  { %1896 = vmatpush3.bf16.msra.mxu0 %v2277_v12 }
  0x5a   :  { %1906 = vmatprep.subr.bf16.mxu0 %v2151_v0 }
 0x123   :  { %v242_v15 = vpop.f32.mrb[0].mxu1 }
 0x124   :  { %v1735_v16 = vpop.f32.mrb[1].mxu1 }
 0x127   :  { %v164_v18 = vpop.f32.mrb[0].mxu0 }
 0x128   :  { %v243_v19 = vadd.f32 %v242_v15, %v164_v18  ;;  %v1728_v20 = vpop.f32.mrb[1].mxu0 }
 0x12a   :  { %v246_v21 = vadd.f32 %v2302_v17, %v243_v19 }
 0x12c   :  { %1963 = vtanh.f32 %v246_v21  ;;  %v1625_v23 = vmul.f32 -1.442695, %v246_v21 }
 0x12e   :  { %1965 = vpow2.f32 %v1625_v23  ;;  %v628_v23 = vld [vmem:[#allocation2 + $0xb] sm:$0x1] }
 0x136   :  { %v1964_v22 = vpop.eup %1963 }
 0x137   :  { %256 = vrot.lane.b32.xlu0 %v1964_v22, %s2154_s10  ;;  %v627_v22 = vld [vmem:[#allocation2 + $0x3] sm:$0x1] }
 0x138   :  { %v1966_v24 = vpop.eup %1965 }
 0x139   :  { %v250_v25 = vadd.f32 1.0, %v1966_v24  ;;  %v706_v24 = vrot.slane %v628_v23, 7 }
 0x13b   :  { %1967 = vrcp.f32 %v250_v25  ;;  %v707_v25 = vsel %vm171_vm1, %v706_v24, %v627_v22 }
 0x145   :  { %v1968_v26 = vpop.eup %1967 }
 0x146   :  { %v254_v29 = vmul.f32 0.0, %v1968_v26 }
 0x1a9   :  { %v257_v27 = vpop.permute.xlu0 %256 }
 0x1aa   :  { %v259_v28 = vmul.f32 %v1968_v26, %v257_v27 }
 0x1ac   :  { %261 = vrot.lane.b32.xlu0 %v259_v28, %s2155_s3 }
 0x21e   :  { %v262_v30 = vpop.permute.xlu0 %261 }
 0x21f   :  { %v264_v31 = vadd.f32 %v262_v30, %v254_v29 }
 0x221   :  { %1969 = vtanh.f32 %v264_v31 }
 0x22b   :  { %v1970_v32 = vpop.eup %1969 }
 0x22c   :  { %267 = vrot.lane.b32.xlu1 %v1970_v32, %s2154_s10 }
 0x29e   :  { %v268_v33 = vpop.permute.xlu1 %267 }
 0x29f   :  { %v270_v34 = vmul.f32 %v1968_v26, %v268_v33 }
 0x2a1   :  { %274 = vrot.lane.b32.xlu1 %v270_v34, %s2155_s3 }
 0x313   :  { %v275_v38 = vpop.permute.xlu1 %274 }
 0x314   :  { %1745 = vmatmul.mubr.msk.f32.vlgmr.msra.gmra.mrb[2].mxu1 %vm94_vm3, %v275_v38 }
 0x315   :  { %1890 = vmatpush3.bf16.msra.mxu1 %v2274_v9  ;;  %1751 = vmatprep.mubr.msk.f32.mxu1 %vm2152_vm0, %v2153_v1 }
 0x316   :  { %1897 = vmatprep.subr.bf16.mxu1 %v2151_v0 }
 0x318   :  { %1752 = vmatmul.mubr.msk.f32.vlgmr.msra.gmra.mrb[4].mxu1 %vm173_vm2, %v351_v39 }
 0x319   :  { %1899 = vmatpush3.bf16.msra.mxu1 %v2274_v9  ;;  %1769 = vmatprep.mubr.msk.f32.mxu1 %vm2152_vm0, %v2153_v1 }
 0x31a   :  { %1900 = vmatprep.subr.bf16.mxu1 %v2151_v0 }
 0x31c   :  { %1770 = vmatmul.mubr.msk.f32.vlgmr.msra.gmra.mrb[6].mxu1 %vm173_vm2, %v529_v59 }
 0x31d   :  { %1902 = vmatpush3.bf16.msra.mxu1 %v2272_v5  ;;  %1780 = vmatprep.mubr.msk.f32.mxu1 %vm2152_vm0, %v2153_v1 }
 0x31e   :  { %1903 = vmatprep.subr.bf16.mxu1 %v2151_v0 }
 0x321   :  { %1905 = vmatpush3.bf16.msra.mxu1 %v2277_v12 }
 0x322   :  { %1915 = vmatprep.subr.bf16.mxu1 %v2151_v0 }
 0x3e7   :  { %v344_v40 = vpop.f32.mrb[2].mxu1 }
 0x3e8   :  { %v1746_v41 = vpop.f32.mrb[3].mxu1 }
 0x3eb   :  { %v420_v42 = vpop.f32.mrb[4].mxu1 }
 0x3ec   :  { %v421_v43 = vadd.f32 %v420_v42, %v344_v40  ;;  %v1753_v44 = vpop.f32.mrb[5].mxu1 }
 0x3ee   :  { %v424_v45 = vadd.f32 %v2302_v17, %v421_v43 }
 0x3ef   :  { %v598_v63 = vpop.f32.mrb[6].mxu1 }
 0x3f0   :  { %1971 = vtanh.f32 %v424_v45  ;;  %v1628_v47 = vmul.f32 -1.442695, %v424_v45  ;;  %v1771_v2 = vpop.f32.mrb[7].mxu1 }
 0x3f2   :  { %1973 = vpow2.f32 %v1628_v47  ;;  %v806_v47 = vld [vmem:[#allocation2 + $0xc] sm:$0x1] }
 0x3fa   :  { %v1972_v46 = vpop.eup %1971 }
 0x3fb   :  { %434 = vrot.lane.b32.xlu0 %v1972_v46, %s2154_s10  ;;  %v805_v46 = vld [vmem:[#allocation2 + $0x4] sm:$0x1] }
 0x3fc   :  { %v1974_v48 = vpop.eup %1973 }
 0x3fd   :  { %v428_v49 = vadd.f32 1.0, %v1974_v48  ;;  %v884_v48 = vrot.slane %v806_v47, 7 }
 0x3ff   :  { %1975 = vrcp.f32 %v428_v49  ;;  %v885_v49 = vsel %vm171_vm1, %v884_v48, %v805_v46 }
 0x409   :  { %v1976_v50 = vpop.eup %1975 }
 0x40a   :  { %v432_v53 = vmul.f32 %v1976_v50, %v264_v31 }
 0x46d   :  { %v435_v51 = vpop.permute.xlu0 %434 }
 0x46e   :  { %v437_v52 = vmul.f32 %v1976_v50, %v435_v51 }
 0x470   :  { %439 = vrot.lane.b32.xlu1 %v437_v52, %s2155_s3 }
 0x4e2   :  { %v440_v54 = vpop.permute.xlu1 %439 }
 0x4e3   :  { %v442_v55 = vadd.f32 %v440_v54, %v432_v53 }
 0x4e5   :  { %1977 = vtanh.f32 %v442_v55 }
 0x4ef   :  { %v1978_v60 = vpop.eup %1977 }
 0x4f0   :  { %445 = vrot.lane.b32.xlu0 %v1978_v60, %s2154_s10 }
 0x562   :  { %v446_v61 = vpop.permute.xlu0 %445 }
 0x563   :  { %v448_v62 = vmul.f32 %v1976_v50, %v446_v61 }
 0x565   :  { %452 = vrot.lane.b32.xlu1 %v448_v62, %s2155_s3 }
 0x5d7   :  { %v453_v3 = vpop.permute.xlu1 %452 }
 0x5d8   :  { %1763 = vmatmul.mubr.msk.f32.vlgmr.msra.gmra.mrb[2].mxu0 %vm94_vm3, %v453_v3 }
 0x5d9   :  { %1908 = vmatpush3.bf16.msra.mxu0 %v2274_v9  ;;  %1787 = vmatprep.mubr.msk.f32.mxu0 %vm2152_vm0, %v2153_v1 }
 0x5da   :  { %1909 = vmatprep.subr.bf16.mxu0 %v2151_v0 }
 0x5dc   :  { %1788 = vmatmul.mubr.msk.f32.vlgmr.msra.gmra.mrb[4].mxu0 %vm173_vm2, %v707_v25 }
 0x5dd   :  { %1911 = vmatpush3.bf16.msra.mxu0 %v2272_v5  ;;  %1798 = vmatprep.mubr.msk.f32.mxu0 %vm2152_vm0, %v2153_v1 }
 0x5de   :  { %1912 = vmatprep.subr.bf16.mxu0 %v2151_v0 }
 0x5e1   :  { %1914 = vmatpush3.bf16.msra.mxu0 %v2277_v12 }
 0x5e2   :  { %1924 = vmatprep.subr.bf16.mxu0 %v2151_v0 }
 0x6ab   :  { %v522_v4 = vpop.f32.mrb[2].mxu0 }
 0x6ac   :  { %v599_v6 = vadd.f32 %v598_v63, %v522_v4  ;;  %v1764_v7 = vpop.f32.mrb[3].mxu0 }
 0x6ae   :  { %v602_v8 = vadd.f32 %v2302_v17, %v599_v6 }
 0x6af   :  { %v776_v29 = vpop.f32.mrb[4].mxu0 }
 0x6b0   :  { %1979 = vtanh.f32 %v602_v8  ;;  %v1631_v11 = vmul.f32 -1.442695, %v602_v8  ;;  %v1789_v30 = vpop.f32.mrb[5].mxu0 }
 0x6b2   :  { %1981 = vpow2.f32 %v1631_v11  ;;  %v984_v11 = vld [vmem:[#allocation2 + $0xd] sm:$0x1] }
 0x6ba   :  { %v1980_v10 = vpop.eup %1979 }
 0x6bb   :  { %612 = vrot.lane.b32.xlu0 %v1980_v10, %s2154_s10  ;;  %v983_v10 = vld [vmem:[#allocation2 + $0x5] sm:$0x1] }
 0x6bc   :  { %v1982_v13 = vpop.eup %1981 }
 0x6bd   :  { %v606_v14 = vadd.f32 1.0, %v1982_v13  ;;  %v1062_v13 = vrot.slane %v984_v11, 7 }
 0x6bf   :  { %1983 = vrcp.f32 %v606_v14  ;;  %v1063_v14 = vsel %vm171_vm1, %v1062_v13, %v983_v10 }
 0x6c9   :  { %v1984_v15 = vpop.eup %1983 }
 0x6ca   :  { %v610_v19 = vmul.f32 %v1984_v15, %v442_v55 }
 0x72d   :  { %v613_v16 = vpop.permute.xlu0 %612 }
 0x72e   :  { %v615_v18 = vmul.f32 %v1984_v15, %v613_v16 }
 0x730   :  { %617 = vrot.lane.b32.xlu1 %v615_v18, %s2155_s3 }
 0x7a2   :  { %v618_v20 = vpop.permute.xlu1 %617 }
 0x7a3   :  { %v620_v21 = vadd.f32 %v618_v20, %v610_v19 }
 0x7a5   :  { %1985 = vtanh.f32 %v620_v21 }
 0x7af   :  { %v1986_v26 = vpop.eup %1985 }
 0x7b0   :  { %623 = vrot.lane.b32.xlu0 %v1986_v26, %s2154_s10 }
 0x822   :  { %v624_v27 = vpop.permute.xlu0 %623 }
 0x823   :  { %v626_v28 = vmul.f32 %v1984_v15, %v624_v27 }
 0x825   :  { %630 = vrot.lane.b32.xlu1 %v626_v28, %s2155_s3 }
 0x897   :  { %v631_v31 = vpop.permute.xlu1 %630 }
 0x898   :  { %1781 = vmatmul.mubr.msk.f32.vlgmr.msra.gmra.mrb[8].mxu1 %vm94_vm3, %v631_v31 }
 0x899   :  { %1917 = vmatpush3.bf16.msra.mxu1 %v2274_v9  ;;  %1805 = vmatprep.mubr.msk.f32.mxu1 %vm2152_vm0, %v2153_v1 }
 0x89a   :  { %1918 = vmatprep.subr.bf16.mxu1 %v2151_v0 }
 0x89c   :  { %1806 = vmatmul.mubr.msk.f32.vlgmr.msra.gmra.mrb[10].mxu1 %vm173_vm2, %v885_v49 }
 0x89d   :  { %1920 = vmatpush3.bf16.msra.mxu1 %v2272_v5  ;;  %1816 = vmatprep.mubr.msk.f32.mxu1 %vm2152_vm0, %v2153_v1 }
 0x89e   :  { %1921 = vmatprep.subr.bf16.mxu1 %v2151_v0 }
 0x8a1   :  { %1923 = vmatpush3.bf16.msra.mxu1 %v2277_v12 }
 0x8a2   :  { %1933 = vmatprep.subr.bf16.mxu1 %v2151_v0 }
 0x96b   :  { %v700_v32 = vpop.f32.mrb[8].mxu1 }
 0x96c   :  { %v777_v33 = vadd.f32 %v776_v29, %v700_v32  ;;  %v1782_v34 = vpop.f32.mrb[9].mxu1 }
 0x96e   :  { %v780_v35 = vadd.f32 %v2302_v17, %v777_v33 }
 0x96f   :  { %v954_v53 = vpop.f32.mrb[10].mxu1 }
 0x970   :  { %1987 = vtanh.f32 %v780_v35  ;;  %v1634_v37 = vmul.f32 -1.442695, %v780_v35  ;;  %v1807_v54 = vpop.f32.mrb[11].mxu1 }
 0x972   :  { %1989 = vpow2.f32 %v1634_v37  ;;  %v1162_v37 = vld [vmem:[#allocation2 + $0xe] sm:$0x1] }
 0x97a   :  { %v1988_v36 = vpop.eup %1987 }
 0x97b   :  { %790 = vrot.lane.b32.xlu0 %v1988_v36, %s2154_s10  ;;  %v1161_v36 = vld [vmem:[#allocation2 + $0x6] sm:$0x1] }
 0x97c   :  { %v1990_v38 = vpop.eup %1989 }
 0x97d   :  { %v784_v39 = vadd.f32 1.0, %v1990_v38  ;;  %v1240_v38 = vrot.slane %v1162_v37, 7 }
 0x97f   :  { %1991 = vrcp.f32 %v784_v39  ;;  %v1241_v39 = vsel %vm171_vm1, %v1240_v38, %v1161_v36 }
 0x989   :  { %v1992_v40 = vpop.eup %1991 }
 0x98a   :  { %v788_v43 = vmul.f32 %v1992_v40, %v620_v21 }
 0x9ed   :  { %v791_v41 = vpop.permute.xlu0 %790 }
 0x9ee   :  { %v793_v42 = vmul.f32 %v1992_v40, %v791_v41 }
 0x9f0   :  { %795 = vrot.lane.b32.xlu1 %v793_v42, %s2155_s3 }
 0xa62   :  { %v796_v44 = vpop.permute.xlu1 %795 }
 0xa63   :  { %v798_v45 = vadd.f32 %v796_v44, %v788_v43 }
 0xa65   :  { %1993 = vtanh.f32 %v798_v45 }
 0xa6f   :  { %v1994_v50 = vpop.eup %1993 }
 0xa70   :  { %801 = vrot.lane.b32.xlu0 %v1994_v50, %s2154_s10 }
 0xae2   :  { %v802_v51 = vpop.permute.xlu0 %801 }
 0xae3   :  { %v804_v52 = vmul.f32 %v1992_v40, %v802_v51 }
 0xae5   :  { %808 = vrot.lane.b32.xlu1 %v804_v52, %s2155_s3 }
 0xb57   :  { %v809_v55 = vpop.permute.xlu1 %808 }
 0xb58   :  { %1799 = vmatmul.mubr.msk.f32.vlgmr.msra.gmra.mrb[6].mxu0 %vm94_vm3, %v809_v55 }
 0xb59   :  { %1926 = vmatpush3.bf16.msra.mxu0 %v2274_v9  ;;  %1823 = vmatprep.mubr.msk.f32.mxu0 %vm2152_vm0, %v2153_v1 }
 0xb5a   :  { %1927 = vmatprep.subr.bf16.mxu0 %v2151_v0 }
 0xb5c   :  { %1824 = vmatmul.mubr.msk.f32.vlgmr.msra.gmra.mrb[8].mxu0 %vm173_vm2, %v1063_v14 }
 0xb5d   :  { %1929 = vmatpush3.bf16.msra.mxu0 %v2272_v5  ;;  %1834 = vmatprep.mubr.msk.f32.mxu0 %vm2152_vm0, %v2153_v1 }
 0xb5e   :  { %1930 = vmatprep.subr.bf16.mxu0 %v2151_v0 }
 0xb61   :  { %1932 = vmatpush3.bf16.msra.mxu0 %v2277_v12 }
 0xb62   :  { %1942 = vmatprep.subr.bf16.mxu0 %v2151_v0 }
 0xc2b   :  { %v878_v56 = vpop.f32.mrb[6].mxu0 }
 0xc2c   :  { %v955_v57 = vadd.f32 %v954_v53, %v878_v56  ;;  %v1800_v58 = vpop.f32.mrb[7].mxu0 }
 0xc2d   :  { %v1340_v58 = vld [vmem:[#allocation2 + $0xf] sm:$0x1] }
 0xc2e   :  { %v958_v59 = vadd.f32 %v2302_v17, %v955_v57  ;;  %v1339_v57 = vld [vmem:[#allocation2 + $0x7] sm:$0x1] }
 0xc2f   :  { %v1132_v19 = vpop.f32.mrb[8].mxu0 }
 0xc30   :  { %1995 = vtanh.f32 %v958_v59  ;;  %v1637_v61 = vmul.f32 -1.442695, %v958_v59  ;;  %v1825_v20 = vpop.f32.mrb[9].mxu0  ;;  %v1418_v59 = vrot.slane %v1340_v58, 7 }
 0xc32   :  { %1997 = vpow2.f32 %v1637_v61 }
 0xc3a   :  { %v1996_v60 = vpop.eup %1995 }
 0xc3b   :  { %968 = vrot.lane.b32.xlu0 %v1996_v60, %s2154_s10  ;;  %v1419_v60 = vsel %vm171_vm1, %v1418_v59, %v1339_v57 }
 0xc3c   :  { %v1998_v62 = vpop.eup %1997 }
 0xc3d   :  { %v962_v63 = vadd.f32 1.0, %v1998_v62 }
 0xc3f   :  { %1999 = vrcp.f32 %v962_v63 }
 0xc49   :  { %v2000_v2 = vpop.eup %1999 }
 0xc4a   :  { %v966_v6 = vmul.f32 %v2000_v2, %v798_v45 }
 0xcad   :  { %v969_v3 = vpop.permute.xlu0 %968 }
 0xcae   :  { %v971_v4 = vmul.f32 %v2000_v2, %v969_v3 }
 0xcb0   :  { %973 = vrot.lane.b32.xlu1 %v971_v4, %s2155_s3 }
 0xd22   :  { %v974_v7 = vpop.permute.xlu1 %973 }
 0xd23   :  { %v976_v8 = vadd.f32 %v974_v7, %v966_v6 }
 0xd25   :  { %2001 = vtanh.f32 %v976_v8 }
 0xd2f   :  { %v2002_v15 = vpop.eup %2001 }
 0xd30   :  { %979 = vrot.lane.b32.xlu0 %v2002_v15, %s2154_s10 }
 0xda2   :  { %v980_v16 = vpop.permute.xlu0 %979 }
 0xda3   :  { %v982_v18 = vmul.f32 %v2000_v2, %v980_v16 }
 0xda5   :  { %986 = vrot.lane.b32.xlu1 %v982_v18, %s2155_s3 }
 0xe17   :  { %v987_v21 = vpop.permute.xlu1 %986 }
 0xe18   :  { %1817 = vmatmul.mubr.msk.f32.vlgmr.msra.gmra.mrb[12].mxu1 %vm94_vm3, %v987_v21 }
 0xe19   :  { %1935 = vmatpush3.bf16.msra.mxu1 %v2274_v9  ;;  %1841 = vmatprep.mubr.msk.f32.mxu1 %vm2152_vm0, %v2153_v1 }
 0xe1a   :  { %1936 = vmatprep.subr.bf16.mxu1 %v2151_v0 }
 0xe1c   :  { %1842 = vmatmul.mubr.msk.f32.vlgmr.msra.gmra.mrb[14].mxu1 %vm173_vm2, %v1241_v39 }
 0xe1d   :  { %1938 = vmatpush3.bf16.msra.mxu1 %v2272_v5  ;;  %1852 = vmatprep.mubr.msk.f32.mxu1 %vm2152_vm0, %v2153_v1 }
 0xe1e   :  { %1939 = vmatprep.subr.bf16.mxu1 %v2151_v0 }
 0xe21   :  { %1941 = vmatpush3.bf16.msra.mxu1 %v2277_v12 }
 0xeeb   :  { %v1056_v22 = vpop.f32.mrb[12].mxu1 }
 0xeec   :  { %v1133_v23 = vadd.f32 %v1132_v19, %v1056_v22  ;;  %v1818_v24 = vpop.f32.mrb[13].mxu1  ;;  %v1517_v22 = vld [vmem:[#allocation8] sm:$0xff] }
 0xeee   :  { %v1136_v25 = vadd.f32 %v2302_v17, %v1133_v23  ;;  %v1519_v23 = vld [vmem:[#allocation8 + $0x10] sm:$0xff] }
 0xeef   :  { %v1310_v43 = vpop.f32.mrb[14].mxu1 }
 0xef0   :  { %2003 = vtanh.f32 %v1136_v25  ;;  %v1640_v27 = vmul.f32 -1.442695, %v1136_v25  ;;  %v1843_v44 = vpop.f32.mrb[15].mxu1  ;;  %v1520_v25 = vld [vmem:[#allocation8 + $0x18] sm:$0xff] }
 0xef2   :  { %2005 = vpow2.f32 %v1640_v27 }
 0xefa   :  { %v2004_v26 = vpop.eup %2003 }
 0xefb   :  { %1146 = vrot.lane.b32.xlu0 %v2004_v26, %s2154_s10  ;;  %v1949_v26 = vpack.c.bf16 %v1520_v25, %v1519_v23 }
 0xefc   :  { %v2006_v28 = vpop.eup %2005 }
 0xefd   :  { %v1140_v29 = vadd.f32 1.0, %v2006_v28 }
 0xeff   :  { %2007 = vrcp.f32 %v1140_v29 }
 0xf09   :  { %v2008_v30 = vpop.eup %2007 }
 0xf0a   :  { %v1144_v33 = vmul.f32 %v2008_v30, %v976_v8 }
 0xf6d   :  { %v1147_v31 = vpop.permute.xlu0 %1146 }
 0xf6e   :  { %v1149_v32 = vmul.f32 %v2008_v30, %v1147_v31  ;;  %v1647_v31 = vld [vmem:[%s2446_s5] ss:$0 sm:$0xff] }
 0xf70   :  { %1151 = vrot.lane.b32.xlu1 %v1149_v32, %s2155_s3 }
 0xfe2   :  { %v1152_v34 = vpop.permute.xlu1 %1151 }
 0xfe3   :  { %v1154_v35 = vadd.f32 %v1152_v34, %v1144_v33 }
 0xfe5   :  { %2009 = vtanh.f32 %v1154_v35 }
 0xfef   :  { %v2010_v40 = vpop.eup %2009 }
 0xff0   :  { %1157 = vrot.lane.b32.xlu0 %v2010_v40, %s2154_s10 }
0x1062   :  { %v1158_v41 = vpop.permute.xlu0 %1157 }
0x1063   :  { %v1160_v42 = vmul.f32 %v2008_v30, %v1158_v41 }
0x1065   :  { %1164 = vrot.lane.b32.xlu1 %v1160_v42, %s2155_s3 }
0x10d7   :  { %v1165_v45 = vpop.permute.xlu1 %1164 }
0x10d8   :  { %1835 = vmatmul.mubr.msk.f32.vlgmr.msra.gmra.mrb[10].mxu0 %vm94_vm3, %v1165_v45 }
0x10d9   :  { %1944 = vmatpush3.bf16.msra.mxu0 %v2274_v9  ;;  %1859 = vmatprep.mubr.msk.f32.mxu0 %vm2152_vm0, %v2153_v1 }
0x10da   :  { %1945 = vmatprep.subr.bf16.mxu0 %v2151_v0 }
0x10dc   :  { %1860 = vmatmul.mubr.msk.f32.vlgmr.msra.gmra.mrb[12].mxu0 %vm173_vm2, %v1419_v60 }
0x10dd   :  { %1870 = vmatprep.mubr.msk.f32.mxu0 %vm2152_vm0, %v2153_v1 }
0x11ab   :  { %v1234_v5 = vpop.f32.mrb[10].mxu0 }
0x11ac   :  { %v1311_v12 = vadd.f32 %v1310_v43, %v1234_v5  ;;  %v1836_v46 = vpop.f32.mrb[11].mxu0 }
0x11ae   :  { %v1314_v47 = vadd.f32 %v2302_v17, %v1311_v12 }
0x11af   :  { %v1488_v2 = vpop.f32.mrb[12].mxu0 }
0x11b0   :  { %2011 = vtanh.f32 %v1314_v47  ;;  %v1643_v49 = vmul.f32 -1.442695, %v1314_v47  ;;  %v1861_v3 = vpop.f32.mrb[13].mxu0 }
0x11b2   :  { %2013 = vpow2.f32 %v1643_v49 }
0x11ba   :  { %v2012_v48 = vpop.eup %2011 }
0x11bb   :  { %1324 = vrot.lane.b32.xlu0 %v2012_v48, %s2154_s10 }
0x11bc   :  { %v2014_v50 = vpop.eup %2013 }
0x11bd   :  { %v1318_v51 = vadd.f32 1.0, %v2014_v50 }
0x11bf   :  { %2015 = vrcp.f32 %v1318_v51 }
0x11c9   :  { %v2016_v9 = vpop.eup %2015 }
0x11ca   :  { %v1322_v54 = vmul.f32 %v2016_v9, %v1154_v35 }
0x122d   :  { %v1325_v52 = vpop.permute.xlu0 %1324 }
0x122e   :  { %v1327_v53 = vmul.f32 %v2016_v9, %v1325_v52 }
0x1230   :  { %1329 = vrot.lane.b32.xlu1 %v1327_v53, %s2155_s3 }
0x12a2   :  { %v1330_v55 = vpop.permute.xlu1 %1329 }
0x12a3   :  { %v1332_v56 = vadd.f32 %v1330_v55, %v1322_v54 }
0x12a5   :  { %2017 = vtanh.f32 %v1332_v56 }
0x12af   :  { %v2018_v61 = vpop.eup %2017 }
0x12b0   :  { %1335 = vrot.lane.b32.xlu0 %v2018_v61, %s2154_s10 }
0x1322   :  { %v1336_v62 = vpop.permute.xlu0 %1335 }
0x1323   :  { %v1338_v63 = vmul.f32 %v2016_v9, %v1336_v62 }
0x1325   :  { %1342 = vrot.lane.b32.xlu1 %v1338_v63, %s2155_s3 }
0x1397   :  { %v1343_v4 = vpop.permute.xlu1 %1342 }
0x1398   :  { %1853 = vmatmul.mubr.msk.f32.vlgmr.msra.gmra.mrb[16].mxu1 %vm94_vm3, %v1343_v4 }
0x146b   :  { %v1412_v6 = vpop.f32.mrb[16].mxu1 }
0x146c   :  { %v1489_v7 = vadd.f32 %v1488_v2, %v1412_v6  ;;  %v1854_v8 = vpop.f32.mrb[17].mxu1 }
0x146e   :  { %v1492_v10 = vadd.f32 %v2302_v17, %v1489_v7  ;;  %v1518_v17 = vld [vmem:[#allocation8 + $0x8] sm:$0xff] }
0x146f   :  { %v1946_v24 = vpack.c.bf16 %v1518_v17, %v1517_v22 }
0x1470   :  { %2019 = vtanh.f32 %v1492_v10  ;;  %v1646_v1 = vmul.f32 -1.442695, %v1492_v10 }
0x1471   :  { %1947 = vmatpush3.bf16.msra.mxu0 %v1946_v24 }
0x1472   :  { %2021 = vpow2.f32 %v1646_v1  ;;  %1948 = vmatprep.subr.bf16.mxu0 %v2151_v0 }
0x1475   :  { %1950 = vmatpush3.bf16.msra.mxu0 %v1949_v26 }
0x147a   :  { %v2020_v11 = vpop.eup %2019 }
0x147b   :  { %1502 = vrot.lane.b32.xlu0 %v2020_v11, %s2154_s10 }
0x147c   :  { %v2022_v13 = vpop.eup %2021 }
0x147d   :  { %v1496_v14 = vadd.f32 1.0, %v2022_v13 }
0x147f   :  { %2023 = vrcp.f32 %v1496_v14 }
0x1489   :  { %v2024_v15 = vpop.eup %2023 }
0x148a   :  { %v1500_v19 = vmul.f32 %v2024_v15, %v1332_v56 }
0x14ed   :  { %v1503_v16 = vpop.permute.xlu0 %1502 }
0x14ee   :  { %v1505_v18 = vmul.f32 %v2024_v15, %v1503_v16 }
0x14f0   :  { %1507 = vrot.lane.b32.xlu1 %v1505_v18, %s2155_s3 }
0x1562   :  { %v1508_v20 = vpop.permute.xlu1 %1507 }
0x1563   :  { %v1510_v21 = vadd.f32 %v1508_v20, %v1500_v19 }
0x1565   :  { %2025 = vtanh.f32 %v1510_v21 }
0x156f   :  { %v2026_v27 = vpop.eup %2025 }
0x1570   :  { %1513 = vrot.lane.b32.xlu0 %v2026_v27, %s2154_s10 }
0x15e2   :  { %v1514_v28 = vpop.permute.xlu0 %1513 }
0x15e3   :  { %v1516_v29 = vmul.f32 %v2024_v15, %v1514_v28 }
0x15e5   :  { %1529 = vrot.lane.b32.xlu1 %v1516_v29, %s2155_s3 }
0x1657   :  { %v1530_v30 = vpop.permute.xlu1 %1529 }
0x1658   :  { %1871 = vmatmul.mubr.msk.f32.vlgmr.msra.gmra.mrb[14].mxu0 %vm94_vm3, %v1530_v30 }
0x172b   :  { %v1599_v32 = vpop.f32.mrb[14].mxu0 }
0x172c   :  { %v1600_v33 = vadd.f32 %v1647_v31, %v1599_v32  ;;  %v1872_v0 = vpop.f32.mrb[15].mxu0 }
0x172e   :  { %v1603_v34 = vmax.f32 %v1600_v33, 0.0 }
0x1730   :  { %1605 = vst.msk [vmem:[#allocation10] sm:$0x3] %vm1604_vm4, %v1603_v34 }
0x1731   :  { %2126 = shalt.err (!%p2123_p8)
}
0x1732   :  { %s2127_s5 = scalar_lea.hbm %s2447_s6, 32 }
0x1733   :  { %p2128_p9 = scmp.ne.s32.totalorder %s2447_s6, %s2127_s5  ;;  %p2131_p10 = scmp.lt.u32.totalorder %s2127_s5, %s2447_s6 }
0x1735   :  { %p2133_p11 = pnand %p2131_p10, %p2128_p9 }
0x1737   :  { %2136 = shalt.err (!%p2133_p11)
}
0x1738   :  { %1615 = dma.vmem_to_hbm [thread:$0]  %s1613_s25, 32, %s2447_s6, [#allocation4]  }
0x1739   :  { %2143 = dma.done.wait [#allocation4], 32  }
0x173a   :  { %2144 = vsyncadd [#allocation4], 4294967264 }
0x173b   :  { %1619 = vsyncpa [#allocation3], 1 }
0x173c   :  { %1620 = vsyncpa [#allocation6], 1 }
0x173d   :  { %1621 = vsyncpa [#allocation9], 1 }
0x173e   :  { %1622 = vsyncpa [#allocation4], 1 }

</bundles_post_ra>
